<compile_context>
chip_gen: v7x
topology: tpu7x:2x2x1
jax: 0.10.0
libtpu: 0.0.40
codegen_flags: <defaults>
</compile_context>

<pallas_src>
import jax
import jax.numpy as jnp
from jax.experimental import pallas as pl
from jax.experimental.pallas import tpu as pltpu


def _make_weighted_sum_kernel(k_ops):
    """Kernel: o = sum_k w[k] * x_k over one dense (TR, TL) tile."""

    def kernel(w_ref, *refs):
        # refs = (x_0, ..., x_{K-1}, o)
        x_refs, o_ref = refs[:k_ops], refs[k_ops]
        acc = w_ref[0] * x_refs[0][...].astype(jnp.float32)
        for k in range(1, k_ops):           # K is small: statically unrolled
            acc = acc + w_ref[k] * x_refs[k][...].astype(jnp.float32)
        o_ref[...] = acc.astype(o_ref.dtype)

    return kernel


def _choose_layout(p, itemsize, k_ops, vmem_budget_bytes):
    """Pick a dense 2-D (rows, lane) view of the flat P elements and a tile.

    Returns ((rows, lane), (tr, tl)).  Blocks are (8*pack, 128)-aligned so
    vregs are fully dense; no padding copy is ever performed.
    """
    # Dense sublane multiple: 8 for f32, 16 for bf16, 32 for int8.
    sub = 8 * max(1, 4 // itemsize)
    # Per-candidate block budget: plateau is ~1 MiB; keep 2 buffers x (K+1)
    # blocks under the overall budget (exact now that blocks are dense).
    per_block = min(1 << 20,
                    max(128 * sub * itemsize,
                        vmem_budget_bytes // (2 * (k_ops + 1))))

    # Prefer a lane dim (multiple of 128) that divides P exactly AND leaves at
    # least `sub` rows, so blocks can be fully sublane-dense.
    lane = None
    for cand in (1024, 512, 256, 128):
        if p % cand == 0 and (p // cand) >= sub:
            lane = cand
            break
    if lane is None:
        for cand in (1024, 512, 256, 128):
            if p % cand == 0:
                lane = cand
                break

    if lane is not None:
        rows = p // lane
        if rows <= sub:
            tr = rows                       # block == full row extent (allowed)
        else:
            tr = per_block // (lane * itemsize)
            tr = max(sub, (tr // sub) * sub)
            if tr >= rows:
                tr = rows
        return (rows, lane), (tr, lane)

    # Fallback (P not a multiple of 128): (1, P) with 128-aligned lane tiles;
    # the last tile is masked by Pallas.  Only 1/8 sublane density, but avoids
    # any extra HBM pad/crop copy.  Correct because the op is elementwise.
    tl = max(128, ((per_block // itemsize) // 128) * 128)
    tl = min(tl, pl.cdiv(p, 128) * 128)
    return (1, p), (1, tl)


def var_darts_input_choice_forward(inputs, alpha, gumbel_key,
                                   vmem_budget_bytes=12 * 1024 * 1024):
    """Forward pass of VarDartsInputChoice.

    inputs     : list/tuple of K arrays, all with identical shape/dtype
    alpha      : (K,) architecture logits
    gumbel_key : PRNG key for the gumbel noise
    """
    k_ops = len(inputs)
    out_shape = inputs[0].shape
    out_dtype = inputs[0].dtype
    itemsize = jnp.dtype(out_dtype).itemsize

    # --- Gumbel softmax, F.gumbel_softmax(alpha, -1): tau = -1 --------------
    # TODO(synk): tau = -1 is the literal PyTorch call (2nd positional arg is
    # tau); it inverts the softmax sharpening but we keep it for fidelity.
    u = jax.random.uniform(
        gumbel_key, alpha.shape, dtype=jnp.float32, minval=1e-10, maxval=1.0
    )
    gumbels = -jnp.log(-jnp.log(u))
    weights = jax.nn.softmax((alpha.astype(jnp.float32) + gumbels) / -1.0, axis=-1)

    p = 1
    for d in out_shape:
        p *= int(d)

    (rows, lane), (tr, tl) = _choose_layout(p, itemsize, k_ops, vmem_budget_bytes)

    # Free reshape of each contiguous candidate into the dense slab; no
    # jnp.stack and no jnp.pad (no extra HBM copies).
    xs = [a.reshape(rows, lane) for a in inputs]

    grid = (pl.cdiv(rows, tr), pl.cdiv(lane, tl))
    block_map = lambda i, j: (i, j)

    in_specs = [pl.BlockSpec(memory_space=pltpu.MemorySpace.SMEM)]  # (K,) weights
    in_specs += [pl.BlockSpec((tr, tl), block_map) for _ in range(k_ops)]

    out2d = pl.pallas_call(
        _make_weighted_sum_kernel(k_ops),
        out_shape=jax.ShapeDtypeStruct((rows, lane), out_dtype),
        grid_spec=pltpu.PrefetchScalarGridSpec(
            num_scalar_prefetch=0,
            grid=grid,
            in_specs=in_specs,
            out_specs=pl.BlockSpec((tr, tl), block_map),
        ),
        compiler_params=pltpu.CompilerParams(
            # Pure data-parallel over the flattened elements: shards across
            # both TensorCores on v7x, no-op on v5e/v6e.
            dimension_semantics=("parallel", "parallel"),
        ),
    )(weights, *xs)

    return out2d.reshape(out_shape)


def _reference_forward(inputs, alpha, gumbel_key):
    """Pure-JAX reference (same gumbel draw) for correctness check."""
    u = jax.random.uniform(
        gumbel_key, alpha.shape, dtype=jnp.float32, minval=1e-10, maxval=1.0
    )
    gumbels = -jnp.log(-jnp.log(u))
    weights = jax.nn.softmax((alpha.astype(jnp.float32) + gumbels) / -1.0, axis=-1)

    stacked = jnp.stack(inputs)                                  # (K, ...)
    wshape = (len(inputs),) + (1,) * (stacked.ndim - 1)
    return jnp.sum(stacked * weights.reshape(wshape), axis=0).astype(inputs[0].dtype)


if __name__ == "__main__":
    key = jax.random.PRNGKey(0)
    k_in, k_alpha, k_gumbel = jax.random.split(key, 3)

    N, C, H, W = 2, 4, 16, 16
    K_CANDIDATES = 3

    in_keys = jax.random.split(k_in, K_CANDIDATES)
    inputs = [
        jax.random.normal(in_keys[i], (N, C, H, W), dtype=jnp.float32)
        for i in range(K_CANDIDATES)
    ]
    alpha = jax.random.normal(k_alpha, (K_CANDIDATES,), dtype=jnp.float32) * 0.001

    out = var_darts_input_choice_forward(inputs, alpha, k_gumbel)
    out = jax.block_until_ready(out)

    ref = jax.block_until_ready(_reference_forward(inputs, alpha, k_gumbel))
    assert out.shape == (N, C, H, W)
    assert jnp.allclose(out, ref, atol=1e-5, rtol=1e-5)

    print("KERNEL_OK")
</pallas_src>

<mosaic_0001>
module attributes {stable_mosaic.version = 11 : i64} {
  func.func @kernel(%arg0: i32, %arg1: i32, %arg2: memref<3xf32, #tpu.memory_space<smem>>, %arg3: memref<8x256xf32, #tpu.memory_space<vmem>>, %arg4: memref<8x256xf32, #tpu.memory_space<vmem>>, %arg5: memref<8x256xf32, #tpu.memory_space<vmem>>, %arg6: memref<8x256xf32, #tpu.memory_space<vmem>>) attributes {dimension_semantics = [#tpu.dimension_semantics<parallel>, #tpu.dimension_semantics<parallel>], iteration_bounds = array<i64: 1, 1>, scalar_prefetch = 0 : i64, scratch_operands = 0 : i64, tpu.core_type = #tpu.core_type<tc>, window_params = [{transform_indices = @transform_0, window_bounds = array<i64: 3>}, {transform_indices = @transform_1, window_bounds = array<i64: 8, 256>}, {transform_indices = @transform_2, window_bounds = array<i64: 8, 256>}, {transform_indices = @transform_3, window_bounds = array<i64: 8, 256>}, {transform_indices = @transform_4, window_bounds = array<i64: 8, 256>}]} {
    %c0 = arith.constant 0 : index
    %0 = memref.load %arg2[%c0] : memref<3xf32, #tpu.memory_space<smem>>
    %c0_0 = arith.constant 0 : index
    %c0_1 = arith.constant 0 : index
    %1 = vector.load %arg3[%c0_0, %c0_1] : memref<8x256xf32, #tpu.memory_space<vmem>>, vector<8x256xf32>
    %2 = vector.broadcast %0 : f32 to vector<8x256xf32>
    %3 = arith.mulf %2, %1 : vector<8x256xf32>
    %c1 = arith.constant 1 : index
    %4 = memref.load %arg2[%c1] : memref<3xf32, #tpu.memory_space<smem>>
    %c0_2 = arith.constant 0 : index
    %c0_3 = arith.constant 0 : index
    %5 = vector.load %arg4[%c0_2, %c0_3] : memref<8x256xf32, #tpu.memory_space<vmem>>, vector<8x256xf32>
    %6 = vector.broadcast %4 : f32 to vector<8x256xf32>
    %7 = arith.mulf %6, %5 : vector<8x256xf32>
    %8 = arith.addf %3, %7 : vector<8x256xf32>
    %c2 = arith.constant 2 : index
    %9 = memref.load %arg2[%c2] : memref<3xf32, #tpu.memory_space<smem>>
    %c0_4 = arith.constant 0 : index
    %c0_5 = arith.constant 0 : index
    %10 = vector.load %arg5[%c0_4, %c0_5] : memref<8x256xf32, #tpu.memory_space<vmem>>, vector<8x256xf32>
    %11 = vector.broadcast %9 : f32 to vector<8x256xf32>
    %12 = arith.mulf %11, %10 : vector<8x256xf32>
    %13 = arith.addf %8, %12 : vector<8x256xf32>
    %c0_6 = arith.constant 0 : index
    %c0_7 = arith.constant 0 : index
    %14 = vector.load %arg6[%c0_6, %c0_7] : memref<8x256xf32, #tpu.memory_space<vmem>>, vector<8x256xf32>
    tpu.vector_store %arg6[%c0_6, %c0_7], %13 {strides = array<i32>} : memref<8x256xf32, #tpu.memory_space<vmem>>, vector<8x256xf32>,
    return
  }
  func.func @transform_0(%arg0: i32, %arg1: i32) -> i32 {
    %c0_i32 = arith.constant 0 : i32
    %c0_i32_0 = arith.constant 0 : i32
    return %c0_i32 : i32
  }
  func.func @transform_1(%arg0: i32, %arg1: i32) -> (i32, i32) {
    %c0_i32 = arith.constant 0 : i32
    return %arg0, %arg1 : i32, i32
  }
  func.func @transform_2(%arg0: i32, %arg1: i32) -> (i32, i32) {
    %c0_i32 = arith.constant 0 : i32
    return %arg0, %arg1 : i32, i32
  }
  func.func @transform_3(%arg0: i32, %arg1: i32) -> (i32, i32) {
    %c0_i32 = arith.constant 0 : i32
    return %arg0, %arg1 : i32, i32
  }
  func.func @transform_4(%arg0: i32, %arg1: i32) -> (i32, i32) {
    %c0_i32 = arith.constant 0 : i32
    return %arg0, %arg1 : i32, i32
  }
}

</mosaic_0001>

<bundles_post_ra>
// kernel: tpu_custom_call.1
= control target key start
LH: loop header
LB: loop body
LE: loop exit
PB: predicated region body
PF: predicated region fallthrough
CT: control target
= control target key end

     0   :  { %9 = vsyncpa [#allocation5], 0  ;;  %s308_s0 = inlined_call_operand.hbm [shape: f32[3], index: 0, kind: input, shape index: {}]   ;;  %s309_s1 = inlined_call_operand.hbm [shape: f32[8,256], index: 1, kind: input, shape index: {}]   ;;  %s310_s2 = inlined_call_operand.hbm [shape: f32[8,256], index: 2, kind: input, shape index: {}]   ;;  %s311_s3 = inlined_call_operand.hbm [shape: f32[8,256], index: 3, kind: input, shape index: {}]   ;;  %s312_s4 = inlined_call_operand.hbm [shape: f32[8,256], index: 4, kind: output, shape index: {}]  }
   0x1   :  { %10 = vsyncpa [#allocation3], 0 }
   0x2   :  { %11 = vsyncpa [#allocation8], 0 }
   0x3   :  { %12 = vsyncpa [#allocation4], 0  ;;  %s218_s15 = smov [#allocation7]   ;;  %s219_s17 = smov [#allocation6]  }
   0x4   :  { %s37_s16 = sshll.u32 %s218_s15, 4  ;;  %s27_s18 = sshll.u32 %s219_s17, 4  ;;  %s38_s16 = int_to_ptr.vmem [resolvable:$true] %s37_s16  ;;  %s28_s18 = int_to_ptr.vmem [resolvable:$true] %s27_s18 }
   0x5   :  { %s112_s21 = scalar_lea.hbm %s310_s2, 256 }
   0x6   :  { %p113_p0 = scmp.ne.s32.totalorder %s310_s2, %s112_s21  ;;  %p116_p1 = scmp.lt.u32.totalorder %s112_s21, %s310_s2 }
   0x8   :  { %p118_p2 = pnand %p116_p1, %p113_p0 }
   0xa   :  { %121 = shalt.err (!%p118_p2)
}
   0xb   :  { %s122_s26 = scalar_lea.vmem %s38_s16, 256  ;;  %p127_p4 = scmp.lt.s32.totalorder %s38_s16, %s38_s16 }
   0xc   :  { %p123_p3 = scmp.ne.s32.totalorder %s38_s16, %s122_s26  ;;  %p128_p5 = scmp.lt.s32.totalorder %s122_s26, %s122_s26 }
   0xe   :  { %p129_p6 = por %p128_p5, %p127_p4 }
  0x10   :  { %p130_p7 = pnand %p129_p6, %p123_p3 }
  0x12   :  { %133 = shalt.err (!%p130_p7)
}
  0x13   :  { %40 = dma.hbm_to_vmem [thread:$0]  %s310_s2, 256, %s38_s16, [#allocation8]  }
  0x14   :  { %s134_s5 = scalar_lea.hbm %s308_s0, 16 }
  0x15   :  { %p135_p8 = scmp.ne.s32.totalorder %s308_s0, %s134_s5  ;;  %p138_p9 = scmp.lt.u32.totalorder %s134_s5, %s308_s0 }
  0x17   :  { %p140_p10 = pnand %p138_p9, %p135_p8 }
  0x19   :  { %143 = shalt.err (!%p140_p10)
}
  0x1a   :  { %s220_s10 = smov [#allocation2]   ;;  %s144_s14 = scalar_lea.hbm %s309_s1, 256 }
  0x1b   :  { %20 = dma.hbm_to_smem %s308_s0, 16, %s220_s10, [#allocation5]  }
  0x1c   :  { %p145_p11 = scmp.ne.s32.totalorder %s309_s1, %s144_s14  ;;  %p148_p12 = scmp.lt.u32.totalorder %s144_s14, %s309_s1 }
  0x1e   :  { %p150_p13 = pnand %p148_p12, %p145_p11 }
  0x20   :  { %153 = shalt.err (!%p150_p13)
}
  0x21   :  { %s154_s20 = scalar_lea.vmem %s28_s18, 256  ;;  %p159_p1 = scmp.lt.s32.totalorder %s28_s18, %s28_s18 }
  0x22   :  { %p155_p0 = scmp.ne.s32.totalorder %s28_s18, %s154_s20  ;;  %p160_p2 = scmp.lt.s32.totalorder %s154_s20, %s154_s20 }
  0x24   :  { %p161_p3 = por %p160_p2, %p159_p1 }
  0x26   :  { %p162_p4 = pnand %p161_p3, %p155_p0 }
  0x28   :  { %165 = shalt.err (!%p162_p4)
}
  0x29   :  { %30 = dma.hbm_to_vmem [thread:$0]  %s309_s1, 256, %s28_s18, [#allocation3]  }
  0x2a   :  { %s221_s22 = smov [#allocation9]   ;;  %s166_s26 = scalar_lea.hbm %s311_s3, 256 }
  0x2b   :  { %s47_s23 = sshll.u32 %s221_s22, 4  ;;  %p167_p5 = scmp.ne.s32.totalorder %s311_s3, %s166_s26  ;;  %s48_s23 = int_to_ptr.vmem [resolvable:$true] %s47_s23 }
  0x2c   :  { %p170_p6 = scmp.lt.u32.totalorder %s166_s26, %s311_s3 }
  0x2e   :  { %p172_p7 = pnand %p170_p6, %p167_p5 }
  0x30   :  { %175 = shalt.err (!%p172_p7)
}
  0x31   :  { %s176_s5 = scalar_lea.vmem %s48_s23, 256  ;;  %p181_p9 = scmp.lt.s32.totalorder %s48_s23, %s48_s23 }
  0x32   :  { %p177_p8 = scmp.ne.s32.totalorder %s48_s23, %s176_s5  ;;  %p182_p10 = scmp.lt.s32.totalorder %s176_s5, %s176_s5 }
  0x34   :  { %p183_p11 = por %p182_p10, %p181_p9 }
  0x36   :  { %p184_p12 = pnand %p183_p11, %p177_p8 }
  0x38   :  { %187 = shalt.err (!%p184_p12)
}
  0x39   :  { %50 = dma.hbm_to_vmem [thread:$0]  %s311_s3, 256, %s48_s23, [#allocation8]  }
  0x3a   :  { %210 = dma.done.wait [#allocation5], 16  }
  0x3b   :  { %211 = vsyncadd [#allocation5], 4294967280 }
  0x3c   :  { %212 = dma.done.wait [#allocation3], 256  }
  0x3d   :  { %213 = vsyncadd [#allocation3], 4294967040 }
  0x3e   :  { %214 = dma.done.wait [#allocation8], 512  }
  0x3f   :  { %215 = vsyncadd [#allocation8], 4294966784 }
  0x40   :  { %63 = sfence }
  0x41   :  { %s64_s6 = sld [smem:[#allocation2]]  ;;  %s105_s7 = sld [smem:[#allocation2 + $0x1]]  ;;  %v65_v0 = vld [vmem:[#allocation6] sm:$0xff]  ;;  %v71_v1 = vld [vmem:[#allocation7] sm:$0xff]  ;;  %v66_v2 = vld [vmem:[#allocation6 + $0x8] sm:$0xff] }
  0x42   :  { %s106_s8 = sld [smem:[#allocation2 + $0x2]]  ;;  %v79_v3 = vld [vmem:[#allocation9] sm:$0xff]  ;;  %v72_v4 = vld [vmem:[#allocation7 + $0x8] sm:$0xff]  ;;  %v80_v5 = vld [vmem:[#allocation9 + $0x8] sm:$0xff]  ;;  %s222_s3 = smov [#allocation10]  }
  0x43   :  { %s94_s9 = sshll.u32 %s222_s3, 4  ;;  %s95_s9 = int_to_ptr.vmem [resolvable:$true] %s94_s9 }
  0x44   :  { %s188_s10 = scalar_lea.vmem %s95_s9, 256  ;;  %p193_p0 = scmp.lt.s32.totalorder %s95_s9, %s95_s9 }
  0x45   :  { %p189_p13 = scmp.ne.s32.totalorder %s95_s9, %s188_s10  ;;  %p194_p1 = scmp.lt.s32.totalorder %s188_s10, %s188_s10 }
  0x47   :  { %v67_v6 = vstv %s64_s6  ;;  %v73_v7 = vstv %s105_s7  ;;  %p195_p2 = por %p194_p1, %p193_p0 }
  0x48   :  { %v68_v8 = vmul.f32 %v67_v6, %v65_v0  ;;  %v74_v9 = vmul.f32 %v73_v7, %v71_v1  ;;  %v81_v10 = vstv %s106_s8  ;;  %v69_v11 = vmul.f32 %v67_v6, %v66_v2 }
  0x49   :  { %v82_v12 = vmul.f32 %v81_v10, %v79_v3  ;;  %v75_v13 = vmul.f32 %v73_v7, %v72_v4  ;;  %v83_v14 = vmul.f32 %v81_v10, %v80_v5  ;;  %p196_p3 = pnand %p195_p2, %p189_p13 }
  0x4a   :  { %v76_v15 = vadd.f32 %v74_v9, %v68_v8 }
  0x4b   :  { %v77_v16 = vadd.f32 %v75_v13, %v69_v11 }
  0x4c   :  { %v84_v17 = vadd.f32 %v82_v12, %v76_v15 }
  0x4d   :  { %v85_v18 = vadd.f32 %v83_v14, %v77_v16 }
  0x4e   :  { %86 = vst [vmem:[#allocation10] sm:$0xff] %v84_v17 }
  0x4f   :  { %87 = vst [vmem:[#allocation10 + $0x8] sm:$0xff] %v85_v18 }
  0x50   :  { %199 = shalt.err (!%p196_p3)
}
  0x51   :  { %s200_s2 = scalar_lea.hbm %s312_s4, 256 }
  0x52   :  { %p201_p4 = scmp.ne.s32.totalorder %s312_s4, %s200_s2  ;;  %p204_p5 = scmp.lt.u32.totalorder %s200_s2, %s312_s4 }
  0x54   :  { %p206_p6 = pnand %p204_p5, %p201_p4 }
  0x56   :  { %209 = shalt.err (!%p206_p6)
}
  0x57   :  { %97 = dma.vmem_to_hbm [thread:$0]  %s95_s9, 256, %s312_s4, [#allocation4]  }
  0x58   :  { %216 = dma.done.wait [#allocation4], 256  }
  0x59   :  { %217 = vsyncadd [#allocation4], 4294967040 }
  0x5a   :  { %101 = vsyncpa [#allocation3], 1 }
  0x5b   :  { %102 = vsyncpa [#allocation8], 1 }
  0x5c   :  { %103 = vsyncpa [#allocation4], 1 }
  0x5d   :  { %104 = vsyncpa [#allocation5], 1 }

</bundles_post_ra>
